<compile_context>
chip_gen: v7x
topology: tpu7x:2x2x1
jax: 0.10.0
libtpu: 0.0.40
codegen_flags: <defaults>
</compile_context>

<pallas_src>
import functools

import jax
import jax.numpy as jnp
from jax.experimental import pallas as pl
from jax.experimental.pallas import tpu as pltpu

_LANE = 128


# ---------------------------------------------------------------------------
# Kernel
# ---------------------------------------------------------------------------
def _policy_kernel(n_enc, n_logits, n_mu, n_std, *refs):
    """refs = [obs, (w, b) * n_enc, w_heads_packed, b_heads_packed, out_slab]."""
    obs_ref = refs[0]
    enc_refs = refs[1:1 + 2 * n_enc]
    wh_ref = refs[1 + 2 * n_enc]
    bh_ref = refs[2 + 2 * n_enc]
    out_ref = refs[-1]

    # --- encoder: (Linear -> Tanh) * n_enc, run exactly once ----------------
    x = obs_ref[...]
    for layer in range(n_enc):
        w = enc_refs[2 * layer][...]              # bf16 [in, out]
        b = enc_refs[2 * layer + 1][...]          # f32  (1, out)  -> sublane broadcast
        y = jnp.dot(x.astype(w.dtype), w, preferred_element_type=jnp.float32) + b
        x = jnp.tanh(y)                            # f32 elementwise

    # --- all heads in ONE packed matmul (single MXU push) -------------------
    wh = wh_ref[...]                               # bf16 [hidden, 128-padded]
    lin = jnp.dot(x.astype(wh.dtype), wh,
                  preferred_element_type=jnp.float32) + bh_ref[...]

    lanes = jax.lax.broadcasted_iota(jnp.int32, lin.shape, dimension=1)

    logp = None
    if n_logits > 0:
        # Categorical(logits=F.log_softmax(head(x), dim=1)); reduce only over
        # the real logit lanes of the packed slab.
        logit_mask = lanes < n_logits
        m = jnp.max(jnp.where(logit_mask, lin, -1e30), axis=1, keepdims=True)
        z = lin - m
        e = jnp.where(logit_mask, jnp.exp(z), 0.0)
        lse = jnp.log(jnp.sum(e, axis=1, keepdims=True))
        logp = z - lse

    box = None
    if n_mu > 0:
        # mu  = 2 * (sigmoid(mu_(x)) - 0.5)
        # std = 2 * sigmoid(std_(x) + 1.0) + 0.001
        mu = 2.0 * (jax.nn.sigmoid(lin) - 0.5)
        std = 2.0 * jax.nn.sigmoid(lin + 1.0) + 0.001
        box = jnp.where(lanes < n_logits + n_mu, mu, std)

    if n_logits > 0 and n_mu > 0:
        out = jnp.where(lanes < n_logits, logp, box)
    elif n_logits > 0:
        out = logp
    else:
        out = box

    out_ref[...] = out   # lane-dense (tb, 128*k) store; padding lanes sliced off outside


# ---------------------------------------------------------------------------
# Wrappers
# ---------------------------------------------------------------------------
def _pack_heads(heads):
    """Concatenate head (w, b) pairs column-wise and pad to a 128-lane multiple."""
    w = jnp.concatenate([w for w, _ in heads], axis=1)
    b = jnp.concatenate([b.reshape(1, -1) for _, b in heads], axis=1)
    total = w.shape[1]
    padded = ((total + _LANE - 1) // _LANE) * _LANE
    if padded != total:
        w = jnp.pad(w, ((0, 0), (0, padded - total)))
        b = jnp.pad(b, ((0, 0), (0, padded - total)))
    return w, b, padded


def _policy_forward(obs, enc_params, heads, n_logits, n_mu, n_std,
                    *, mxu_dtype=jnp.bfloat16, batch_block=256):
    B, in_dim = obs.shape
    n_enc = len(enc_params)
    w_heads, b_heads, padded = _pack_heads(heads)

    flat = [obs]
    for w, b in enc_params:
        flat += [w.astype(mxu_dtype), b.reshape(1, -1).astype(jnp.float32)]
    flat += [w_heads.astype(mxu_dtype), b_heads.astype(jnp.float32)]

    # Batch grid: trivial (grid=(1,)) for small B; shards across TensorCores
    # (v7x megacore) for production batches.
    tb = B if B <= batch_block else batch_block
    if B % tb != 0:
        tb = B
    grid = (B // tb,)

    in_specs = [pl.BlockSpec((tb, in_dim), lambda i: (i, 0))]
    in_specs += [pl.BlockSpec(a.shape, lambda i: (0, 0)) for a in flat[1:]]
    out_specs = pl.BlockSpec((tb, padded), lambda i: (i, 0))

    kernel = functools.partial(_policy_kernel, n_enc, n_logits, n_mu, n_std)
    return pl.pallas_call(
        kernel,
        grid=grid,
        out_shape=jax.ShapeDtypeStruct((B, padded), jnp.float32),
        in_specs=in_specs,
        out_specs=out_specs,
        compiler_params=pltpu.CompilerParams(dimension_semantics=("parallel",)),
    )(*flat)


def policy_forward_discrete(obs, enc_params, w_d, b_d):
    """Discrete action space: returns log_softmax(head(enc(obs))) = Categorical logits."""
    n_actions = w_d.shape[1]
    slab = _policy_forward(obs, enc_params, [(w_d, b_d)],
                           n_logits=n_actions, n_mu=0, n_std=0)
    return slab[:, :n_actions]


def policy_forward_box(obs, enc_params, w_mu, b_mu, w_std, b_std, action_shape):
    """Box action space: returns (mu, std) of the Normal, reshaped to (-1,) + action_shape."""
    ad = w_mu.shape[1]
    slab = _policy_forward(obs, enc_params, [(w_mu, b_mu), (w_std, b_std)],
                           n_logits=0, n_mu=ad, n_std=ad)
    new_shape = (-1,) + tuple(action_shape)
    return slab[:, :ad].reshape(new_shape), slab[:, ad:2 * ad].reshape(new_shape)


def policy_forward_fused(obs, enc_params, w_d, b_d, w_mu, b_mu, w_std, b_std, action_shape):
    """Both heads from ONE kernel launch (encoder runs once)."""
    na = w_d.shape[1]
    ad = w_mu.shape[1]
    slab = _policy_forward(obs, enc_params,
                           [(w_d, b_d), (w_mu, b_mu), (w_std, b_std)],
                           n_logits=na, n_mu=ad, n_std=ad)
    new_shape = (-1,) + tuple(action_shape)
    log_probs = slab[:, :na]
    mu = slab[:, na:na + ad].reshape(new_shape)
    std = slab[:, na + ad:na + 2 * ad].reshape(new_shape)
    return log_probs, mu, std


# ---------------------------------------------------------------------------
# Reference (pure JAX, f32) and deterministic init
# ---------------------------------------------------------------------------
def _reference(obs, enc_params, w_d, b_d, w_mu, b_mu, w_std, b_std):
    x = obs
    for w, b in enc_params:
        x = jnp.tanh(x @ w + b.reshape(1, -1))
    logits = x @ w_d + b_d.reshape(1, -1)
    logp = jax.nn.log_softmax(logits, axis=1)
    mu = 2.0 * (jax.nn.sigmoid(x @ w_mu + b_mu.reshape(1, -1)) - 0.5)
    std = 2.0 * jax.nn.sigmoid(x @ w_std + b_std.reshape(1, -1) + 1.0) + 0.001
    return logp, mu, std


def make_linear(key, in_dim, out_dim):
    kw, kb = jax.random.split(key)
    bound = 1.0 / jnp.sqrt(jnp.float32(in_dim))
    w = jax.random.uniform(kw, (in_dim, out_dim), jnp.float32, -bound, bound)
    b = jax.random.uniform(kb, (1, out_dim), jnp.float32, -bound, bound)   # keep 2-D
    return w, b


if __name__ == "__main__":
    B = 8          # batch
    IN_DIM = 32    # observation dim
    HIDDENS = [32, 32]
    N_ACTIONS = 6        # Discrete(6)
    BOX_SHAPE = (3,)     # Box(low=-1, high=1, shape=(3,))
    ACTION_DIM = 3

    key = jax.random.PRNGKey(0)
    keys = jax.random.split(key, 8)

    layer_dims = [IN_DIM] + HIDDENS
    enc_params = []
    for i, (d_in, d_out) in enumerate(zip(layer_dims, layer_dims[1:])):
        enc_params.append(make_linear(keys[i], d_in, d_out))

    w_d, b_d = make_linear(keys[4], layer_dims[-1], N_ACTIONS)
    w_mu, b_mu = make_linear(keys[5], layer_dims[-1], ACTION_DIM)
    w_std, b_std = make_linear(keys[6], layer_dims[-1], ACTION_DIM)

    obs = jax.random.normal(keys[7], (B, IN_DIM), jnp.float32)

    # Fused path: one pallas_call, encoder runs once, all three outputs.
    log_probs, mu, std = policy_forward_fused(
        obs, enc_params, w_d, b_d, w_mu, b_mu, w_std, b_std, BOX_SHAPE)

    # Per-action-space wrappers (module semantics: Discrete OR Box), each one kernel.
    log_probs_d = policy_forward_discrete(obs, enc_params, w_d, b_d)
    mu_b, std_b = policy_forward_box(obs, enc_params, w_mu, b_mu, w_std, b_std, BOX_SHAPE)

    jax.block_until_ready((log_probs, mu, std, log_probs_d, mu_b, std_b))

    assert log_probs.shape == (B, N_ACTIONS)
    assert mu.shape == (B,) + BOX_SHAPE and std.shape == (B,) + BOX_SHAPE

    # Fused and standalone kernels must agree (identical packed columns).
    assert jnp.allclose(log_probs, log_probs_d, atol=1e-5)
    assert jnp.allclose(mu, mu_b, atol=1e-5) and jnp.allclose(std, std_b, atol=1e-5)

    # Check against plain-JAX f32 reference (loose tol: bf16 MXU inputs).
    ref_lp, ref_mu, ref_std = _reference(obs, enc_params, w_d, b_d, w_mu, b_mu, w_std, b_std)
    assert float(jnp.max(jnp.abs(log_probs - ref_lp))) < 5e-2
    assert float(jnp.max(jnp.abs(mu - ref_mu.reshape(mu.shape)))) < 5e-2
    assert float(jnp.max(jnp.abs(std - ref_std.reshape(std.shape)))) < 5e-2

    # TODO(synk): torch's Categorical/Normal distribution objects have no Pallas
    # equivalent; the kernels return their parameters (log-probs / mu, std).
    print("KERNEL_OK")
</pallas_src>

<mosaic_0001>
module attributes {stable_mosaic.version = 11 : i64} {
  func.func @_policy_kernel(%arg0: i32, %arg1: memref<8x32xf32, #tpu.memory_space<vmem>>, %arg2: memref<32x32xbf16, #tpu.memory_space<vmem>>, %arg3: memref<1x32xf32, #tpu.memory_space<vmem>>, %arg4: memref<32x32xbf16, #tpu.memory_space<vmem>>, %arg5: memref<1x32xf32, #tpu.memory_space<vmem>>, %arg6: memref<32x128xbf16, #tpu.memory_space<vmem>>, %arg7: memref<1x128xf32, #tpu.memory_space<vmem>>, %arg8: memref<8x128xf32, #tpu.memory_space<vmem>>) attributes {dimension_semantics = [#tpu.dimension_semantics<parallel>], iteration_bounds = array<i64: 1>, scalar_prefetch = 0 : i64, scratch_operands = 0 : i64, tpu.core_type = #tpu.core_type<tc>, window_params = [{transform_indices = @transform_0, window_bounds = array<i64: 8, 32>}, {pipeline_mode = #tpu.pipeline_mode<synchronous>, transform_indices = @transform_1, window_bounds = array<i64: 32, 32>}, {pipeline_mode = #tpu.pipeline_mode<synchronous>, transform_indices = @transform_2, window_bounds = array<i64: 1, 32>}, {pipeline_mode = #tpu.pipeline_mode<synchronous>, transform_indices = @transform_3, window_bounds = array<i64: 32, 32>}, {pipeline_mode = #tpu.pipeline_mode<synchronous>, transform_indices = @transform_4, window_bounds = array<i64: 1, 32>}, {pipeline_mode = #tpu.pipeline_mode<synchronous>, transform_indices = @transform_5, window_bounds = array<i64: 32, 128>}, {pipeline_mode = #tpu.pipeline_mode<synchronous>, transform_indices = @transform_6, window_bounds = array<i64: 1, 128>}, {transform_indices = @transform_7, window_bounds = array<i64: 8, 128>}]} {
    %c0 = arith.constant 0 : index
    %c0_0 = arith.constant 0 : index
    %0 = vector.load %arg1[%c0, %c0_0] : memref<8x32xf32, #tpu.memory_space<vmem>>, vector<8x32xf32>
    %c0_1 = arith.constant 0 : index
    %c0_2 = arith.constant 0 : index
    %1 = vector.load %arg2[%c0_1, %c0_2] : memref<32x32xbf16, #tpu.memory_space<vmem>>, vector<32x32xbf16>
    %c0_3 = arith.constant 0 : index
    %c0_4 = arith.constant 0 : index
    %2 = vector.load %arg3[%c0_3, %c0_4] : memref<1x32xf32, #tpu.memory_space<vmem>>, vector<1x32xf32>
    %3 = arith.truncf %0 : vector<8x32xf32> to vector<8x32xbf16>
    %cst = arith.constant dense<0.000000e+00> : vector<8x32xf32>
    %4 = tpu.matmul %3, %1, %cst {dimension_numbers = #tpu.dot_dimension_numbers<[1], [0], [0], [1], [0, 0, 1, 1], [], []>} : vector<8x32xbf16>, vector<32x32xbf16>, vector<8x32xf32> -> vector<8x32xf32>
    %5 = vector.broadcast %2 : vector<1x32xf32> to vector<8x32xf32>
    %6 = arith.addf %4, %5 : vector<8x32xf32>
    %7 = math.tanh %6 : vector<8x32xf32>
    %c0_5 = arith.constant 0 : index
    %c0_6 = arith.constant 0 : index
    %8 = vector.load %arg4[%c0_5, %c0_6] : memref<32x32xbf16, #tpu.memory_space<vmem>>, vector<32x32xbf16>
    %c0_7 = arith.constant 0 : index
    %c0_8 = arith.constant 0 : index
    %9 = vector.load %arg5[%c0_7, %c0_8] : memref<1x32xf32, #tpu.memory_space<vmem>>, vector<1x32xf32>
    %10 = arith.truncf %7 : vector<8x32xf32> to vector<8x32xbf16>
    %cst_9 = arith.constant dense<0.000000e+00> : vector<8x32xf32>
    %11 = tpu.matmul %10, %8, %cst_9 {dimension_numbers = #tpu.dot_dimension_numbers<[1], [0], [0], [1], [0, 0, 1, 1], [], []>} : vector<8x32xbf16>, vector<32x32xbf16>, vector<8x32xf32> -> vector<8x32xf32>
    %12 = vector.broadcast %9 : vector<1x32xf32> to vector<8x32xf32>
    %13 = arith.addf %11, %12 : vector<8x32xf32>
    %14 = math.tanh %13 : vector<8x32xf32>
    %c0_10 = arith.constant 0 : index
    %c0_11 = arith.constant 0 : index
    %15 = vector.load %arg6[%c0_10, %c0_11] : memref<32x128xbf16, #tpu.memory_space<vmem>>, vector<32x128xbf16>
    %16 = arith.truncf %14 : vector<8x32xf32> to vector<8x32xbf16>
    %cst_12 = arith.constant dense<0.000000e+00> : vector<8x128xf32>
    %17 = tpu.matmul %16, %15, %cst_12 {dimension_numbers = #tpu.dot_dimension_numbers<[1], [0], [0], [1], [0, 0, 1, 1], [], []>} : vector<8x32xbf16>, vector<32x128xbf16>, vector<8x128xf32> -> vector<8x128xf32>
    %c0_13 = arith.constant 0 : index
    %c0_14 = arith.constant 0 : index
    %18 = vector.load %arg7[%c0_13, %c0_14] : memref<1x128xf32, #tpu.memory_space<vmem>>, vector<1x128xf32>
    %19 = vector.broadcast %18 : vector<1x128xf32> to vector<8x128xf32>
    %20 = arith.addf %17, %19 : vector<8x128xf32>
    %21 = tpu.iota {dimensions = array<i32: 1>} : vector<8x128xi32>
    %c6_i32 = arith.constant 6 : i32
    %22 = vector.broadcast %c6_i32 : i32 to vector<8x128xi32>
    %23 = arith.cmpi slt, %21, %22 : vector<8x128xi32>
    %cst_15 = arith.constant -1.000000e+30 : f32
    %24 = vector.broadcast %cst_15 : f32 to vector<8x128xf32>
    %25 = arith.select %23, %20, %24 : vector<8x128xi1>, vector<8x128xf32>
    %cst_16 = arith.constant dense<0xFF800000> : vector<8xf32>
    %26 = vector.multi_reduction <maximumf>, %25, %cst_16 [1] : vector<8x128xf32> to vector<8xf32>
    %27 = vector.shape_cast %26 : vector<8xf32> to vector<8x1xf32>
    %28 = vector.broadcast %27 : vector<8x1xf32> to vector<8x128xf32>
    %29 = arith.subf %20, %28 : vector<8x128xf32>
    %30 = math.exp %29 : vector<8x128xf32>
    %cst_17 = arith.constant 0.000000e+00 : f32
    %31 = vector.broadcast %cst_17 : f32 to vector<8x128xf32>
    %32 = arith.select %23, %30, %31 : vector<8x128xi1>, vector<8x128xf32>
    %cst_18 = arith.constant dense<0.000000e+00> : vector<8xf32>
    %33 = vector.multi_reduction <add>, %32, %cst_18 [1] : vector<8x128xf32> to vector<8xf32>
    %34 = vector.shape_cast %33 : vector<8xf32> to vector<8x1xf32>
    %35 = math.log %34 : vector<8x1xf32>
    %36 = vector.broadcast %35 : vector<8x1xf32> to vector<8x128xf32>
    %37 = arith.subf %29, %36 : vector<8x128xf32>
    %38 = arith.negf %20 : vector<8x128xf32>
    %39 = math.exp %38 : vector<8x128xf32>
    %cst_19 = arith.constant 1.000000e+00 : f32
    %40 = vector.broadcast %cst_19 : f32 to vector<8x128xf32>
    %41 = arith.addf %40, %39 : vector<8x128xf32>
    %42 = arith.divf %40, %41 : vector<8x128xf32>
    %cst_20 = arith.constant 5.000000e-01 : f32
    %43 = vector.broadcast %cst_20 : f32 to vector<8x128xf32>
    %44 = arith.subf %42, %43 : vector<8x128xf32>
    %cst_21 = arith.constant 2.000000e+00 : f32
    %45 = vector.broadcast %cst_21 : f32 to vector<8x128xf32>
    %46 = arith.mulf %45, %44 : vector<8x128xf32>
    %cst_22 = arith.constant 1.000000e+00 : f32
    %47 = vector.broadcast %cst_22 : f32 to vector<8x128xf32>
    %48 = arith.addf %20, %47 : vector<8x128xf32>
    %49 = arith.negf %48 : vector<8x128xf32>
    %50 = math.exp %49 : vector<8x128xf32>
    %cst_23 = arith.constant 1.000000e+00 : f32
    %51 = vector.broadcast %cst_23 : f32 to vector<8x128xf32>
    %52 = arith.addf %51, %50 : vector<8x128xf32>
    %53 = arith.divf %51, %52 : vector<8x128xf32>
    %cst_24 = arith.constant 2.000000e+00 : f32
    %54 = vector.broadcast %cst_24 : f32 to vector<8x128xf32>
    %55 = arith.mulf %54, %53 : vector<8x128xf32>
    %cst_25 = arith.constant 1.000000e-03 : f32
    %56 = vector.broadcast %cst_25 : f32 to vector<8x128xf32>
    %57 = arith.addf %55, %56 : vector<8x128xf32>
    %c9_i32 = arith.constant 9 : i32
    %58 = vector.broadcast %c9_i32 : i32 to vector<8x128xi32>
    %59 = arith.cmpi slt, %21, %58 : vector<8x128xi32>
    %60 = arith.select %59, %46, %57 : vector<8x128xi1>, vector<8x128xf32>
    %c6_i32_26 = arith.constant 6 : i32
    %61 = vector.broadcast %c6_i32_26 : i32 to vector<8x128xi32>
    %62 = arith.cmpi slt, %21, %61 : vector<8x128xi32>
    %63 = arith.select %62, %37, %60 : vector<8x128xi1>, vector<8x128xf32>
    %c0_27 = arith.constant 0 : index
    %c0_28 = arith.constant 0 : index
    %64 = vector.load %arg8[%c0_27, %c0_28] : memref<8x128xf32, #tpu.memory_space<vmem>>, vector<8x128xf32>
    tpu.vector_store %arg8[%c0_27, %c0_28], %63 {strides = array<i32>} : memref<8x128xf32, #tpu.memory_space<vmem>>, vector<8x128xf32>,
    return
  }
  func.func @transform_0(%arg0: i32) -> (i32, i32) {
    %c0_i32 = arith.constant 0 : i32
    %c0_i32_0 = arith.constant 0 : i32
    return %arg0, %c0_i32 : i32, i32
  }
  func.func @transform_1(%arg0: i32) -> (i32, i32) {
    %c0_i32 = arith.constant 0 : i32
    %c0_i32_0 = arith.constant 0 : i32
    %c0_i32_1 = arith.constant 0 : i32
    return %c0_i32, %c0_i32_0 : i32, i32
  }
  func.func @transform_2(%arg0: i32) -> (i32, i32) {
    %c0_i32 = arith.constant 0 : i32
    %c0_i32_0 = arith.constant 0 : i32
    %c0_i32_1 = arith.constant 0 : i32
    return %c0_i32, %c0_i32_0 : i32, i32
  }
  func.func @transform_3(%arg0: i32) -> (i32, i32) {
    %c0_i32 = arith.constant 0 : i32
    %c0_i32_0 = arith.constant 0 : i32
    %c0_i32_1 = arith.constant 0 : i32
    return %c0_i32, %c0_i32_0 : i32, i32
  }
  func.func @transform_4(%arg0: i32) -> (i32, i32) {
    %c0_i32 = arith.constant 0 : i32
    %c0_i32_0 = arith.constant 0 : i32
    %c0_i32_1 = arith.constant 0 : i32
    return %c0_i32, %c0_i32_0 : i32, i32
  }
  func.func @transform_5(%arg0: i32) -> (i32, i32) {
    %c0_i32 = arith.constant 0 : i32
    %c0_i32_0 = arith.constant 0 : i32
    %c0_i32_1 = arith.constant 0 : i32
    return %c0_i32, %c0_i32_0 : i32, i32
  }
  func.func @transform_6(%arg0: i32) -> (i32, i32) {
    %c0_i32 = arith.constant 0 : i32
    %c0_i32_0 = arith.constant 0 : i32
    %c0_i32_1 = arith.constant 0 : i32
    return %c0_i32, %c0_i32_0 : i32, i32
  }
  func.func @transform_7(%arg0: i32) -> (i32, i32) {
    %c0_i32 = arith.constant 0 : i32
    %c0_i32_0 = arith.constant 0 : i32
    return %arg0, %c0_i32 : i32, i32
  }
}

</mosaic_0001>

<bundles_post_ra>
// kernel: tpu_custom_call.1
= control target key start
LH: loop header
LB: loop body
LE: loop exit
PB: predicated region body
PF: predicated region fallthrough
CT: control target
= control target key end

     0   :  { %12 = vsyncpa [#allocation3], 0  ;;  %s619_s0 = inlined_call_operand.hbm [shape: f32[8,32], index: 0, kind: input, shape index: {}]   ;;  %s620_s1 = inlined_call_operand.hbm [shape: bf16[32,32], index: 1, kind: input, shape index: {}]   ;;  %s621_s2 = inlined_call_operand.vmem [shape: f32[1,32], index: 2, kind: input, shape index: {}]   ;;  %s622_s3 = inlined_call_operand.hbm [shape: bf16[32,32], index: 3, kind: input, shape index: {}]   ;;  %s623_s4 = inlined_call_operand.vmem [shape: f32[1,32], index: 4, kind: input, shape index: {}]   ;;  %s624_s5 = inlined_call_operand.vmem [shape: bf16[32,128], index: 5, kind: input, shape index: {}]   ;;  %s625_s6 = inlined_call_operand.vmem [shape: f32[1,128], index: 6, kind: input, shape index: {}]   ;;  %s626_s7 = inlined_call_operand.hbm [shape: f32[8,128], index: 7, kind: output, shape index: {}]  }
   0x1   :  { %13 = vsyncpa [#allocation6], 0 }
   0x2   :  { %14 = vsyncpa [#allocation4], 0  ;;  %s496_s24 = smov [#allocation5]   ;;  %s402_s28 = scalar_lea.hbm %s620_s1, 256 }
   0x3   :  { %s30_s25 = sshll.u32 %s496_s24, 4  ;;  %p403_p0 = scmp.ne.s32.totalorder %s620_s1, %s402_s28  ;;  %s31_s25 = int_to_ptr.vmem [resolvable:$true] %s30_s25 }
   0x4   :  { %p406_p1 = scmp.lt.u32.totalorder %s402_s28, %s620_s1 }
   0x6   :  { %p408_p2 = pnand %p406_p1, %p403_p0 }
   0x8   :  { %411 = shalt.err (!%p408_p2)
}
   0x9   :  { %s412_s10 = scalar_lea.vmem %s31_s25, 256  ;;  %p417_p4 = scmp.lt.s32.totalorder %s31_s25, %s31_s25 }
   0xa   :  { %p413_p3 = scmp.ne.s32.totalorder %s31_s25, %s412_s10  ;;  %p418_p5 = scmp.lt.s32.totalorder %s412_s10, %s412_s10 }
   0xc   :  { %p419_p6 = por %p418_p5, %p417_p4 }
   0xe   :  { %p420_p7 = pnand %p419_p6, %p413_p3 }
  0x10   :  { %423 = shalt.err (!%p420_p7)
}
  0x11   :  { %s497_s11 = smov 64   ;;  %s498_s12 = smov 4  }
  0x12   :  { %36 = dma.hbm_to_vmem [thread:$0]  %s620_s1, 256, %s31_s25, [#allocation6], %s497_s11, %s497_s11, %s498_s12  }
  0x13   :  { %s499_s15 = smov [#allocation2]   ;;  %s500_s17 = smov [#allocation7]  }
  0x14   :  { %s21_s16 = sshll.u32 %s499_s15, 4  ;;  %s44_s18 = sshll.u32 %s500_s17, 4  ;;  %s22_s16 = int_to_ptr.vmem [resolvable:$true] %s21_s16  ;;  %s45_s18 = int_to_ptr.vmem [resolvable:$true] %s44_s18 }
  0x15   :  { %s424_s21 = scalar_lea.hbm %s619_s0, 128 }
  0x16   :  { %p425_p8 = scmp.ne.s32.totalorder %s619_s0, %s424_s21  ;;  %p428_p9 = scmp.lt.u32.totalorder %s424_s21, %s619_s0 }
  0x18   :  { %p430_p10 = pnand %p428_p9, %p425_p8 }
  0x1a   :  { %433 = shalt.err (!%p430_p10)
}
  0x1b   :  { %s434_s1 = scalar_lea.vmem %s22_s16, 128  ;;  %p439_p12 = scmp.lt.s32.totalorder %s22_s16, %s22_s16 }
  0x1c   :  { %p435_p11 = scmp.ne.s32.totalorder %s22_s16, %s434_s1  ;;  %p440_p13 = scmp.lt.s32.totalorder %s434_s1, %s434_s1 }
  0x1e   :  { %p441_p0 = por %p440_p13, %p439_p12 }
  0x20   :  { %p442_p1 = pnand %p441_p0, %p435_p11 }
  0x22   :  { %445 = shalt.err (!%p442_p1)
}
  0x23   :  { %24 = dma.hbm_to_vmem [thread:$0]  %s619_s0, 128, %s22_s16, [#allocation3]  }
  0x24   :  { %s446_s30 = scalar_lea.hbm %s622_s3, 256 }
  0x25   :  { %p447_p2 = scmp.ne.s32.totalorder %s622_s3, %s446_s30  ;;  %p450_p3 = scmp.lt.u32.totalorder %s446_s30, %s622_s3 }
  0x27   :  { %p452_p4 = pnand %p450_p3, %p447_p2 }
  0x29   :  { %455 = shalt.err (!%p452_p4)
}
  0x2a   :  { %s456_s14 = scalar_lea.vmem %s45_s18, 256  ;;  %p461_p6 = scmp.lt.s32.totalorder %s45_s18, %s45_s18 }
  0x2b   :  { %p457_p5 = scmp.ne.s32.totalorder %s45_s18, %s456_s14  ;;  %p462_p7 = scmp.lt.s32.totalorder %s456_s14, %s456_s14 }
  0x2d   :  { %p463_p8 = por %p462_p7, %p461_p6 }
  0x2f   :  { %p464_p9 = pnand %p463_p8, %p457_p5 }
  0x31   :  { %467 = shalt.err (!%p464_p9)
}
  0x32   :  { %50 = dma.hbm_to_vmem [thread:$0]  %s622_s3, 256, %s45_s18, [#allocation6], %s497_s11, %s497_s11, %s498_s12  }
  0x33   :  { %490 = dma.done.wait [#allocation3], 128  }
  0x34   :  { %491 = vsyncadd [#allocation3], 4294967168 }
  0x35   :  { %492 = dma.done.wait [#allocation6], 512  }
  0x36   :  { %493 = vsyncadd [#allocation6], 4294966784  ;;  %v501_v0 = vmov 0.0   ;;  %vm502_vm0 = vmmov 0   ;;  %v380_v1 = vld [vmem:[#allocation5] sm:$0xff]   ;;  %v381_v2 = vld [vmem:[#allocation5 + $0x8] sm:$0xff]   ;;  %v272_v25 = vlaneseq }
  0x37   :  { %348 = vmatprep.subr.bf16.mxu0 %v501_v0  ;;  %352 = vmatprep.mubr.msk.bf16.mxu0 %vm502_vm0, %v501_v0  ;;  %v67_v3 = vld [vmem:[#allocation2] sm:$0xff]  ;;  %vm92_vm1 = vcmask 261120   ;;  %v382_v5 = vld [vmem:[#allocation7] sm:$0xff]   ;;  %v324_v7 = vld [vmem:[%s621_s2] ss:$0 sm:$0xff] }
  0x38   :  { %356 = vmatprep.subr.bf16.mxu1 %v501_v0  ;;  %360 = vmatprep.mubr.msk.bf16.mxu1 %vm502_vm0, %v501_v0  ;;  %v73_v4 = vpack.c.bf16 %v67_v3, %v67_v3  ;;  %v383_v6 = vld [vmem:[#allocation7 + $0x8] sm:$0xff]   ;;  %v384_v15 = vld [vmem:[%s624_s5] sm:$0xff]   ;;  %v385_v16 = vld [vmem:[%s624_s5 + $0x8] sm:$0xff]   ;;  %v273_v26 = vand.u32 127, %v272_v25 }
  0x39   :  { %349 = vmatpush3.bf16.msra.mxu0 %v380_v1  ;;  %357 = vmatpush3.bf16.msra.mxu1 %v382_v5  ;;  %v328_v17 = vld [vmem:[%s623_s4] ss:$0 sm:$0xff]  ;;  %s503_s4 = smov [#allocation8]  }
  0x3a   :  { %350 = vmatprep.subr.bf16.mxu0 %v501_v0  ;;  %358 = vmatprep.subr.bf16.mxu1 %v501_v0  ;;  %v332_v27 = vld [vmem:[%s625_s6] ss:$0 sm:$0xff]  ;;  %vm274_vm2 = vcmp.lt.s32.totalorder %v273_v26, 6  ;;  %vm304_vm3 = vcmp.lt.s32.totalorder %v273_v26, 9  ;;  %s314_s5 = sshll.u32 %s503_s4, 4  ;;  %s315_s5 = int_to_ptr.vmem [resolvable:$true] %s314_s5 }
  0x3b   :  { %s468_s6 = scalar_lea.vmem %s315_s5, 128  ;;  %p473_p11 = scmp.lt.s32.totalorder %s315_s5, %s315_s5 }
  0x3c   :  { %p469_p10 = scmp.ne.s32.totalorder %s315_s5, %s468_s6  ;;  %p474_p12 = scmp.lt.s32.totalorder %s468_s6, %s468_s6 }
  0x3d   :  { %351 = vmatpush3.bf16.msra.mxu0 %v381_v2  ;;  %359 = vmatpush3.bf16.msra.mxu1 %v383_v6 }
  0x3e   :  { %364 = vmatprep.subr.bf16.mxu0 %v501_v0  ;;  %p475_p13 = por %p474_p12, %p473_p11 }
  0x40   :  { %353 = vmatmul.mubr.msk.bf16.vlgmr.msra.gmra.mrb[0].mxu0 %vm92_vm1, %v73_v4  ;;  %p476_p0 = pnand %p475_p13, %p469_p10 }
  0x41   :  { %368 = vmatprep.mubr.msk.bf16.mxu0 %vm502_vm0, %v501_v0  ;;  %365 = vmatpush3.bf16.msra.mxu0 %v384_v15 }
  0x42   :  { %366 = vmatprep.subr.bf16.mxu0 %v501_v0 }
  0x45   :  { %367 = vmatpush3.bf16.msra.mxu0 %v385_v16 }
 0x113   :  { %v130_v8 = vpop.f32.mrb[0].mxu0 }
 0x114   :  { %v131_v9 = vadd.f32 %v324_v7, %v130_v8  ;;  %v354_v10 = vpop.f32.mrb[1].mxu0 }
 0x115   :  { %v133_v11 = vpop.f32.mrb[2].mxu0 }
 0x116   :  { %386 = vtanh.f32 %v131_v9  ;;  %v355_v12 = vpop.f32.mrb[3].mxu0 }
 0x120   :  { %v387_v13 = vpop.eup %386 }
 0x121   :  { %v142_v14 = vpack.c.bf16 %v387_v13, %v387_v13 }
 0x123   :  { %361 = vmatmul.mubr.msk.bf16.vlgmr.msra.gmra.mrb[0].mxu1 %vm92_vm1, %v142_v14 }
 0x1f6   :  { %v198_v18 = vpop.f32.mrb[0].mxu1 }
 0x1f7   :  { %v199_v19 = vadd.f32 %v328_v17, %v198_v18  ;;  %v362_v20 = vpop.f32.mrb[1].mxu1 }
 0x1f8   :  { %v201_v21 = vpop.f32.mrb[2].mxu1 }
 0x1f9   :  { %388 = vtanh.f32 %v199_v19  ;;  %v363_v22 = vpop.f32.mrb[3].mxu1 }
 0x203   :  { %v389_v23 = vpop.eup %388 }
 0x204   :  { %v209_v24 = vpack.c.bf16 %v389_v23, %v389_v23 }
 0x206   :  { %369 = vmatmul.mubr.msk.bf16.vlgmr.msra.gmra.mrb[4].mxu0 %vm92_vm1, %v209_v24 }
 0x2d9   :  { %v266_v28 = vpop.f32.mrb[4].mxu0 }
 0x2da   :  { %v267_v29 = vadd.f32 %v332_v27, %v266_v28  ;;  %v370_v30 = vpop.f32.mrb[5].mxu0 }
 0x2db   :  { %v269_v31 = vpop.f32.mrb[6].mxu0 }
 0x2dc   :  { %v371_v32 = vpop.f32.mrb[7].mxu0  ;;  %v275_v33 = vsel %vm274_vm2, %v267_v29, -1e+30  ;;  %v295_v39 = vadd.f32 1.0, %v267_v29  ;;  %v336_v41 = vmul.f32 -1.442695, %v267_v29 }
 0x2dd   :  { %276 = vmax.xlane.f32.xlu0 %v275_v33 }
 0x2de   :  { %v338_v40 = vmul.f32 -1.442695, %v295_v39 }
 0x36a   :  { %v277_v34 = vpop.xlane.xlu0 %276 }
 0x36b   :  { %v278_v35 = vsub.f32 %v267_v29, %v277_v34 }
 0x36d   :  { %v279_v36 = vmul.f32 1.442695, %v278_v35 }
 0x36f   :  { %390 = vpow2.f32 %v279_v36 }
 0x370   :  { %392 = vpow2.f32 %v338_v40 }
 0x371   :  { %394 = vpow2.f32 %v336_v41 }
 0x379   :  { %v391_v37 = vpop.eup %390 }
 0x37a   :  { %v281_v38 = vsel %vm274_vm2, %v391_v37, 0.0  ;;  %v393_v42 = vpop.eup %392 }
 0x37b   :  { %282 = vadd.xlane.f32.xlu0 %v281_v38  ;;  %v395_v43 = vpop.eup %394  ;;  %v299_v44 = vadd.f32 1.0, %v393_v42 }
 0x37c   :  { %v290_v45 = vadd.f32 1.0, %v395_v43 }
 0x37d   :  { %396 = vrcp.f32 %v299_v44 }
 0x37e   :  { %398 = vrcp.f32 %v290_v45 }
 0x387   :  { %v397_v47 = vpop.eup %396 }
 0x388   :  { %v399_v48 = vpop.eup %398  ;;  %v302_v49 = vmul.f32 2.0, %v397_v47 }
 0x389   :  { %v337_v50 = vadd.f32 -0.5, %v399_v48 }
 0x38a   :  { %v303_v52 = vadd.f32 0.001, %v302_v49 }
 0x38b   :  { %v294_v54 = vmul.f32 2.0, %v337_v50 }
 0x38d   :  { %v305_v56 = vsel %vm304_vm3, %v294_v54, %v303_v52 }
 0x408   :  { %v283_v46 = vpop.xlane.xlu0 %282 }
 0x409   :  { %400 = vlog2.f32 %v283_v46 }
 0x413   :  { %v401_v51 = vpop.eup %400 }
 0x414   :  { %v285_v53 = vmul.f32 0.6931472, %v401_v51 }
 0x416   :  { %v286_v55 = vsub.f32 %v278_v35, %v285_v53 }
 0x418   :  { %v306_v57 = vsel %vm274_vm2, %v286_v55, %v305_v56 }
 0x419   :  { %307 = vst [vmem:[#allocation8] sm:$0xff] %v306_v57 }
 0x41a   :  { %479 = shalt.err (!%p476_p0)
}
 0x41b   :  { %s480_s24 = scalar_lea.hbm %s626_s7, 128 }
 0x41c   :  { %p481_p1 = scmp.ne.s32.totalorder %s626_s7, %s480_s24  ;;  %p484_p2 = scmp.lt.u32.totalorder %s480_s24, %s626_s7 }
 0x41e   :  { %p486_p3 = pnand %p484_p2, %p481_p1 }
 0x420   :  { %489 = shalt.err (!%p486_p3)
}
 0x421   :  { %317 = dma.vmem_to_hbm [thread:$0]  %s315_s5, 128, %s626_s7, [#allocation4]  }
 0x422   :  { %494 = dma.done.wait [#allocation4], 128  }
 0x423   :  { %495 = vsyncadd [#allocation4], 4294967168 }
 0x424   :  { %321 = vsyncpa [#allocation3], 1 }
 0x425   :  { %322 = vsyncpa [#allocation6], 1 }
 0x426   :  { %323 = vsyncpa [#allocation4], 1 }

</bundles_post_ra>
